<compile_context>
chip_gen: v6e
topology: v6e:2x2x1
jax: 0.10.0
libtpu: 0.0.40
codegen_flags: <defaults>
</compile_context>

<pallas_src>
import functools

import jax
import jax.numpy as jnp
from jax.experimental import pallas as pl
from jax.experimental.pallas import tpu as pltpu


_VMEM_LIMIT_BYTES = 32 * 1024 * 1024  # safe on v5e/v6e (128 MiB) and v7x (64 MiB)


def _focal_kernel(pred_ref, tgt_ref, alpha_ref, out_ref, acc_ref,
                  *, gamma, hw_total, tile_hw, use_alpha):
    hw_i = pl.program_id(1)

    @pl.when(hw_i == 0)
    def _():
        acc_ref[...] = jnp.zeros_like(acc_ref)

    x = pred_ref[...].astype(jnp.float32)            # (C, T)  lane-dense
    C, T = x.shape

    # Numerically-stable log-softmax along the class (sublane) axis.
    m = jnp.max(x, axis=0, keepdims=True)            # (1, T)
    z = x - m
    lse = jnp.log(jnp.sum(jnp.exp(z), axis=0, keepdims=True))   # (1, T)

    # Gather logpt (and alpha) at the target class via a one-hot select --
    # no dynamic gather needed, just VPU compares + an XLU sublane reduce.
    tgt = tgt_ref[...]                               # (1, T) int32
    cls = jax.lax.broadcasted_iota(jnp.int32, (C, T), 0)
    hit = cls == tgt                                 # (C, T) bool

    # sum_c onehot*(z - lse) == sum_c onehot*z - lse   (onehot sums to 1)
    logpt = jnp.sum(jnp.where(hit, z, 0.0), axis=0, keepdims=True) - lse  # (1, T)
    pt = jnp.exp(logpt)

    if use_alpha:
        alpha_b = jnp.broadcast_to(alpha_ref[...].astype(jnp.float32), (C, T))
        at = jnp.sum(jnp.where(hit, alpha_b, 0.0), axis=0, keepdims=True)  # (1, T)
        logpt = logpt * at

    # Focal weight: clamp (avoids NaN from pow when 1-pt rounds < 0) and use
    # plain multiplies for small integer gamma instead of EUP exp/log pow.
    one_minus_pt = jnp.maximum(1.0 - pt, 0.0)
    g = float(gamma)
    if g == 0.0:
        focal_w = jnp.ones_like(pt)
    elif g.is_integer() and 1.0 <= g <= 4.0:
        focal_w = one_minus_pt
        for _ in range(int(g) - 1):
            focal_w = focal_w * one_minus_pt
    else:
        focal_w = one_minus_pt ** g

    loss = -1.0 * focal_w * logpt                    # (1, T)

    # Mask lanes past the true spatial extent (ragged last tile, no host pad);
    # jnp.where is a select, so garbage/NaN in padded lanes cannot propagate.
    col = hw_i * tile_hw + jax.lax.broadcasted_iota(jnp.int32, (1, T), 1)
    acc_ref[...] += jnp.where(col < hw_total, loss, 0.0)

    @pl.when(hw_i == pl.num_programs(1) - 1)
    def _():
        out_ref[...] = jnp.sum(acc_ref[...], axis=1, keepdims=True)   # (1, 1)


def _pick_tile_hw(hw_total, num_classes, pred_itemsize):
    """Pick a lane width so each pred block is ~1 MiB but fits VMEM comfortably."""
    # Rough per-lane VMEM footprint: double-buffered pred + int32 target blocks,
    # the f32 accumulator scratch, and a handful of (C,T)/(1,T) f32 temporaries.
    per_lane = (2 * num_classes * pred_itemsize      # pred, double-buffered
                + 2 * 4                              # int32 targets, double-buffered
                + 4                                  # f32 accumulator scratch
                + 6 * num_classes * 4                # f32 (C,T) temporaries
                + 8 * 4)                             # f32 (1,T) temporaries
    budget = _VMEM_LIMIT_BYTES // 2                  # headroom for the compiler
    max_lanes = max(128, budget // per_lane)
    # ~1 MiB of logits per block so DMA time dwarfs the per-step overhead.
    target_lanes = max(128, (1 << 20) // max(1, num_classes * pred_itemsize))
    lanes = int(min(max_lanes, target_lanes, 1 << 16))
    if hw_total <= lanes:
        return hw_total                              # single full-width tile
    return max(128, (lanes // 128) * 128)            # multiple of 128 (lane axis)


def focal_loss(pred_nchw, target_nhw, *, gamma=2.0, alpha=None, size_average=True):
    """FocalLoss.forward for NCHW logits and NHW integer targets."""
    N, C, H, W = pred_nchw.shape
    HW = H * W
    R = N * HW

    # Metadata-only reshapes -- no transpose / pad / dtype cast of the logits.
    pred3 = pred_nchw.reshape(N, C, HW)              # native dtype passes through
    tgt3 = target_nhw.reshape(N, 1, HW).astype(jnp.int32)

    use_alpha = alpha is not None
    if not use_alpha:
        alpha_col = jnp.ones((C, 1), jnp.float32)    # placeholder; unused in-kernel
    else:
        if isinstance(alpha, (float, int)):
            alpha_vec = jnp.array([alpha, 1.0 - alpha], jnp.float32)
        else:
            alpha_vec = jnp.asarray(alpha, jnp.float32).reshape(-1)
        assert alpha_vec.shape[0] >= C, "alpha must cover all classes"
        alpha_col = alpha_vec[:C].reshape(C, 1)

    tile_hw = _pick_tile_hw(HW, C, pred3.dtype.itemsize)
    grid = (N, pl.cdiv(HW, tile_hw))

    kernel = functools.partial(_focal_kernel, gamma=float(gamma),
                               hw_total=HW, tile_hw=tile_hw, use_alpha=use_alpha)

    partials = pl.pallas_call(
        kernel,
        out_shape=jax.ShapeDtypeStruct((N, 1, 1), jnp.float32),
        grid_spec=pltpu.PrefetchScalarGridSpec(
            num_scalar_prefetch=0,
            grid=grid,
            in_specs=[
                # leading None dim is squeezed out of the kernel view
                pl.BlockSpec((None, C, tile_hw), lambda n, hw: (n, 0, hw)),
                pl.BlockSpec((None, 1, tile_hw), lambda n, hw: (n, 0, hw)),
                pl.BlockSpec((C, 1), lambda n, hw: (0, 0)),
            ],
            out_specs=pl.BlockSpec((None, 1, 1), lambda n, hw: (n, 0, 0)),
            scratch_shapes=[pltpu.VMEM((1, tile_hw), jnp.float32)],
        ),
        compiler_params=pltpu.CompilerParams(
            dimension_semantics=("parallel", "arbitrary"),
            vmem_limit_bytes=_VMEM_LIMIT_BYTES),
    )(pred3, tgt3, alpha_col)

    total = jnp.sum(partials)
    if size_average:
        return total / R
    return total


def _reference(pred_nchw, target_nhw, gamma, alpha_vec, size_average):
    N, C, H, W = pred_nchw.shape
    pred2d = jnp.transpose(pred_nchw.reshape(N, C, H * W), (0, 2, 1)).reshape(-1, C)
    tgt = target_nhw.reshape(-1).astype(jnp.int32)
    logsm = jax.nn.log_softmax(pred2d.astype(jnp.float32), axis=1)
    logpt = jnp.take_along_axis(logsm, tgt[:, None], axis=1)[:, 0]
    pt = jnp.exp(logpt)
    if alpha_vec is not None:
        logpt = logpt * alpha_vec[tgt]
    loss = -1.0 * (1.0 - pt) ** gamma * logpt
    return loss.mean() if size_average else loss.sum()


if __name__ == "__main__":
    key = jax.random.PRNGKey(0)
    k1, k2 = jax.random.split(key)

    N, C, H, W = 2, 4, 16, 16
    pred = jax.random.normal(k1, (N, C, H, W), dtype=jnp.float32)
    target = jax.random.randint(k2, (N, H, W), 0, C, dtype=jnp.int32)

    gamma = 2.0
    alpha = [0.25, 0.5, 0.75, 1.0]  # per-class alpha (length C)

    # With per-class alpha and mean reduction.
    out = focal_loss(pred, target, gamma=gamma, alpha=alpha, size_average=True)
    out = jax.block_until_ready(out)
    ref = _reference(pred, target, gamma, jnp.asarray(alpha, jnp.float32), True)
    assert jnp.allclose(out, ref, rtol=1e-5, atol=1e-6), (out, ref)

    # Without alpha and sum reduction (alpha path compiled out).
    out2 = focal_loss(pred, target, gamma=gamma, alpha=None, size_average=False)
    out2 = jax.block_until_ready(out2)
    ref2 = _reference(pred, target, gamma, None, False)
    assert jnp.allclose(out2, ref2, rtol=1e-5, atol=1e-5), (out2, ref2)

    print("KERNEL_OK")
</pallas_src>

<mosaic_0001>
module attributes {stable_mosaic.version = 11 : i64} {
  func.func @_focal_kernel(%arg0: i32, %arg1: i32, %arg2: memref<1x4x256xf32, #tpu.memory_space<vmem>>, %arg3: memref<1x1x256xi32, #tpu.memory_space<vmem>>, %arg4: memref<4x1xf32, #tpu.memory_space<vmem>>, %arg5: memref<1x1x1xf32, #tpu.memory_space<vmem>>, %arg6: memref<1x256xf32, #tpu.memory_space<vmem>>) attributes {dimension_semantics = [#tpu.dimension_semantics<parallel>, #tpu.dimension_semantics<arbitrary>], iteration_bounds = array<i64: 2, 1>, scalar_prefetch = 0 : i64, scratch_operands = 1 : i64, tpu.core_type = #tpu.core_type<tc>, window_params = [{transform_indices = @transform_0, window_bounds = array<i64: 1, 4, 256>}, {transform_indices = @transform_1, window_bounds = array<i64: 1, 1, 256>}, {pipeline_mode = #tpu.pipeline_mode<synchronous>, transform_indices = @transform_2, window_bounds = array<i64: 4, 1>}, {transform_indices = @transform_3, window_bounds = array<i64: 1, 1, 1>}]} {
    %c0_i32 = arith.constant 0 : i32
    %0 = arith.cmpi eq, %arg1, %c0_i32 : i32
    %1 = arith.extui %0 : i1 to i32
    %c0_i32_0 = arith.constant 0 : i32
    %2 = arith.cmpi ne, %1, %c0_i32_0 : i32
    scf.if %2 {
      %cst_24 = arith.constant 0.000000e+00 : f32
      %54 = vector.broadcast %cst_24 : f32 to vector<1x256xf32>
      %c0_25 = arith.constant 0 : index
      %c0_26 = arith.constant 0 : index
      %55 = vector.load %arg6[%c0_25, %c0_26] : memref<1x256xf32, #tpu.memory_space<vmem>>, vector<1x256xf32>
      tpu.vector_store %arg6[%c0_25, %c0_26], %54 {strides = array<i32>} : memref<1x256xf32, #tpu.memory_space<vmem>>, vector<1x256xf32>,
    } else {
    }
    %c0 = arith.constant 0 : index
    %c0_1 = arith.constant 0 : index
    %c0_2 = arith.constant 0 : index
    %3 = vector.load %arg2[%c0, %c0_1, %c0_2] : memref<1x4x256xf32, #tpu.memory_space<vmem>>, vector<1x4x256xf32>
    %4 = vector.shape_cast %3 : vector<1x4x256xf32> to vector<4x256xf32>
    %cst = arith.constant dense<0xFF800000> : vector<256xf32>
    %5 = vector.multi_reduction <maximumf>, %4, %cst [0] : vector<4x256xf32> to vector<256xf32>
    %6 = vector.shape_cast %5 : vector<256xf32> to vector<1x256xf32>
    %7 = vector.broadcast %6 : vector<1x256xf32> to vector<4x256xf32>
    %8 = arith.subf %4, %7 : vector<4x256xf32>
    %9 = math.exp %8 : vector<4x256xf32>
    %cst_3 = arith.constant dense<0.000000e+00> : vector<256xf32>
    %10 = vector.multi_reduction <add>, %9, %cst_3 [0] : vector<4x256xf32> to vector<256xf32>
    %11 = vector.shape_cast %10 : vector<256xf32> to vector<1x256xf32>
    %12 = math.log %11 : vector<1x256xf32>
    %c0_4 = arith.constant 0 : index
    %c0_5 = arith.constant 0 : index
    %c0_6 = arith.constant 0 : index
    %13 = vector.load %arg3[%c0_4, %c0_5, %c0_6] : memref<1x1x256xi32, #tpu.memory_space<vmem>>, vector<1x1x256xi32>
    %14 = vector.shape_cast %13 : vector<1x1x256xi32> to vector<1x256xi32>
    %15 = tpu.iota {dimensions = array<i32: 0>} : vector<4x256xi32>
    %16 = vector.broadcast %14 : vector<1x256xi32> to vector<4x256xi32>
    %17 = arith.cmpi eq, %15, %16 : vector<4x256xi32>
    %cst_7 = arith.constant 0.000000e+00 : f32
    %18 = vector.broadcast %cst_7 : f32 to vector<4x256xf32>
    %19 = arith.select %17, %8, %18 : vector<4x256xi1>, vector<4x256xf32>
    %cst_8 = arith.constant dense<0.000000e+00> : vector<256xf32>
    %20 = vector.multi_reduction <add>, %19, %cst_8 [0] : vector<4x256xf32> to vector<256xf32>
    %21 = vector.shape_cast %20 : vector<256xf32> to vector<1x256xf32>
    %22 = arith.subf %21, %12 : vector<1x256xf32>
    %23 = math.exp %22 : vector<1x256xf32>
    %c0_9 = arith.constant 0 : index
    %c0_10 = arith.constant 0 : index
    %24 = vector.load %arg4[%c0_9, %c0_10] : memref<4x1xf32, #tpu.memory_space<vmem>>, vector<4x1xf32>
    %25 = vector.shape_cast %24 : vector<4x1xf32> to vector<4x1xf32>
    %26 = vector.broadcast %25 : vector<4x1xf32> to vector<4x256xf32>
    %cst_11 = arith.constant 0.000000e+00 : f32
    %27 = vector.broadcast %cst_11 : f32 to vector<4x256xf32>
    %28 = arith.select %17, %26, %27 : vector<4x256xi1>, vector<4x256xf32>
    %cst_12 = arith.constant dense<0.000000e+00> : vector<256xf32>
    %29 = vector.multi_reduction <add>, %28, %cst_12 [0] : vector<4x256xf32> to vector<256xf32>
    %30 = vector.shape_cast %29 : vector<256xf32> to vector<1x256xf32>
    %31 = arith.mulf %22, %30 : vector<1x256xf32>
    %cst_13 = arith.constant 1.000000e+00 : f32
    %32 = vector.broadcast %cst_13 : f32 to vector<1x256xf32>
    %33 = arith.subf %32, %23 : vector<1x256xf32>
    %cst_14 = arith.constant 0.000000e+00 : f32
    %34 = vector.broadcast %cst_14 : f32 to vector<1x256xf32>
    %35 = arith.maximumf %33, %34 : vector<1x256xf32>
    %36 = arith.mulf %35, %35 : vector<1x256xf32>
    %cst_15 = arith.constant -1.000000e+00 : f32
    %37 = vector.broadcast %cst_15 : f32 to vector<1x256xf32>
    %38 = arith.mulf %37, %36 : vector<1x256xf32>
    %39 = arith.mulf %38, %31 : vector<1x256xf32>
    %c256_i32 = arith.constant 256 : i32
    %40 = arith.muli %arg1, %c256_i32 : i32
    %41 = tpu.iota {dimensions = array<i32: 1>} : vector<1x256xi32>
    %42 = vector.broadcast %40 : i32 to vector<1x256xi32>
    %43 = arith.addi %42, %41 : vector<1x256xi32>
    %c0_16 = arith.constant 0 : index
    %c0_17 = arith.constant 0 : index
    %44 = vector.load %arg6[%c0_16, %c0_17] : memref<1x256xf32, #tpu.memory_space<vmem>>, vector<1x256xf32>
    %c256_i32_18 = arith.constant 256 : i32
    %45 = vector.broadcast %c256_i32_18 : i32 to vector<1x256xi32>
    %46 = arith.cmpi slt, %43, %45 : vector<1x256xi32>
    %cst_19 = arith.constant 0.000000e+00 : f32
    %47 = vector.broadcast %cst_19 : f32 to vector<1x256xf32>
    %48 = arith.select %46, %39, %47 : vector<1x256xi1>, vector<1x256xf32>
    %49 = arith.addf %44, %48 : vector<1x256xf32>
    %c0_20 = arith.constant 0 : index
    %c0_21 = arith.constant 0 : index
    %50 = vector.load %arg6[%c0_20, %c0_21] : memref<1x256xf32, #tpu.memory_space<vmem>>, vector<1x256xf32>
    tpu.vector_store %arg6[%c0_20, %c0_21], %49 {strides = array<i32>} : memref<1x256xf32, #tpu.memory_space<vmem>>, vector<1x256xf32>,
    %c0_i32_22 = arith.constant 0 : i32
    %51 = arith.cmpi eq, %arg1, %c0_i32_22 : i32
    %52 = arith.extui %51 : i1 to i32
    %c0_i32_23 = arith.constant 0 : i32
    %53 = arith.cmpi ne, %52, %c0_i32_23 : i32
    scf.if %53 {
      %c0_24 = arith.constant 0 : index
      %c0_25 = arith.constant 0 : index
      %54 = vector.load %arg6[%c0_24, %c0_25] : memref<1x256xf32, #tpu.memory_space<vmem>>, vector<1x256xf32>
      %cst_26 = arith.constant dense<0.000000e+00> : vector<1xf32>
      %55 = vector.multi_reduction <add>, %54, %cst_26 [1] : vector<1x256xf32> to vector<1xf32>
      %56 = vector.shape_cast %55 : vector<1xf32> to vector<1x1xf32>
      %c0_27 = arith.constant 0 : index
      %c0_28 = arith.constant 0 : index
      %c0_29 = arith.constant 0 : index
      %57 = vector.load %arg5[%c0_27, %c0_28, %c0_29] : memref<1x1x1xf32, #tpu.memory_space<vmem>>, vector<1x1x1xf32>
      %58 = vector.shape_cast %57 : vector<1x1x1xf32> to vector<1x1xf32>
      %59 = vector.shape_cast %56 : vector<1x1xf32> to vector<1x1x1xf32>
      tpu.vector_store %arg5[%c0_27, %c0_28, %c0_29], %59 {strides = array<i32>} : memref<1x1x1xf32, #tpu.memory_space<vmem>>, vector<1x1x1xf32>,
    } else {
    }
    return
  }
  func.func @transform_0(%arg0: i32, %arg1: i32) -> (i32, i32, i32) {
    %c0_i32 = arith.constant 0 : i32
    %c0_i32_0 = arith.constant 0 : i32
    return %arg0, %c0_i32, %arg1 : i32, i32, i32
  }
  func.func @transform_1(%arg0: i32, %arg1: i32) -> (i32, i32, i32) {
    %c0_i32 = arith.constant 0 : i32
    %c0_i32_0 = arith.constant 0 : i32
    return %arg0, %c0_i32, %arg1 : i32, i32, i32
  }
  func.func @transform_2(%arg0: i32, %arg1: i32) -> (i32, i32) {
    %c0_i32 = arith.constant 0 : i32
    %c0_i32_0 = arith.constant 0 : i32
    %c0_i32_1 = arith.constant 0 : i32
    return %c0_i32, %c0_i32_0 : i32, i32
  }
  func.func @transform_3(%arg0: i32, %arg1: i32) -> (i32, i32, i32) {
    %c0_i32 = arith.constant 0 : i32
    %c0_i32_0 = arith.constant 0 : i32
    %c0_i32_1 = arith.constant 0 : i32
    return %arg0, %c0_i32, %c0_i32_0 : i32, i32, i32
  }
}

</mosaic_0001>

<bundles_post_ra>
// kernel: tpu_custom_call.1
= control target key start
LH: loop header
LB: loop body
LE: loop exit
PB: predicated region body
PF: predicated region fallthrough
CT: control target
= control target key end

     0   :  { %8 = vsyncpa [#allocation4], 0  ;;  %s843_s0 = inlined_call_operand.hbm [shape: f32[2,4,256], index: 0, kind: input, shape index: {}]   ;;  %s844_s1 = inlined_call_operand.vmem [shape: s32[2,1,256], index: 1, kind: input, shape index: {}]   ;;  %s845_s2 = inlined_call_operand.vmem [shape: f32[4,1], index: 2, kind: input, shape index: {}]   ;;  %s846_s3 = inlined_call_operand.vmem [shape: f32[2,1,1], index: 3, kind: output, shape index: {}]  }
   0x1   :  { %10 = vsyncpa [#allocation4 + $0x1], 0  ;;  %s694_s12 = smov 0   ;;  %s696_s13 = smov 0  }
   0x2   :  { %s698_s14 = smov 0   ;;  %s700_s15 = smov 0  }
   0x3   :  { %s702_s16 = smov 0   ;;  %s704_s17 = smov 0  }
   0x4 LB: > { %s507_s18 = sadd.s32 4294967295, %s668_s17   ;;  %s28_s19 = sadd.s32 1, %s664_s16  ;;  %s668_s17 = sphi %s704_s17, %s16_s17   ;;  %s664_s16 = sphi %s702_s16, %s856_s16   ;;  %s660_s15 = sphi %s700_s15, %s855_s15   ;;  %s656_s14 = sphi %s698_s14, %s854_s14   ;;  %s652_s13 = sphi %s696_s13, %s853_s13   ;;  %s648_s12 = sphi %s694_s12, %s852_s12  }
   0x5   : > { %p30_p0 = scmp.ge.s32.totalorder %s28_s19, 2  ;;  %s37_s20 = sadd.s32 1, %s656_s14 }
   0x6   : > { %p44_p1 = scmp.ne.s32.totalorder %s656_s14, %s652_s13  ;;  %p45_p2 = scmp.eq.s32.totalorder %s668_s17, 0 }
   0x7   : > { %s858_s19 = smov (%p30_p0, %s28_s19), 0  ;;  %p50_p4 = scmp.ne.s32.totalorder %s652_s13, %s648_s12 }
   0x8   : > { %p730_p3 = por %p45_p2, %p44_p1  ;;  %s32_s22 = ssub.s32 %s664_s16, %s858_s19 }
   0x9   : > { %p51_p5 = scmp.eq.s32.totalorder %s507_s18, 0  ;;  %p35_p6 = scmp.eq.s32.totalorder %s32_s22, 0 }
   0xa   : > { %p526_p8 = scmp.lt.s32.totalorder %s668_s17, 2  ;;  %s152_s25 = sand.u32 1, %s656_s14  }
   0xb   : > { %p737_p7 = por %p51_p5, %p50_p4  ;;  %s519_s26 = sshll.u32 %s664_s16, 7 }
   0xc   : > { %s743_s24 = scalar_select %p35_p6, %s656_s14, %s37_s20  }
   0xd   : > { %s511_s27 = sshll.u32 %s152_s25, 3  ;;  %s164_s30 = scalar_lea.hbm %s843_s0, %s519_s26 }
   0xe   : > { %s156_s4 = scalar_lea.vmem [#allocation3], %s511_s27  ;;  %p752_p9 = pnand %p526_p8, %p730_p3 }
   0xf   : > { %s166_s5 = sshll.u32 %s156_s4, 4  ;;  %p514_p10 = scmp.ge.s32.totalorder %s668_s17, 1  ;;  %s167_s5 = int_to_ptr.vmem [resolvable:$true] %s166_s5 }
  0x10   : > { %p183_p11 = scmp.lt.s32.totalorder %s668_s17, 3  ;;  %s153_s7 = scalar_lea.sflag [#allocation4], %s152_s25 }
  0x11   : > { %p592_p12 = pneg %p752_p9  ;;  %s603_s8 = scalar_lea.vmem %s167_s5, 128 }
  0x12   : > { %p604_p13 = scmp.ne.s32.totalorder %s167_s5, %s603_s8  ;;  %s670_s9 = smov [#allocation3]  }
  0x13   : > { %s608_s10 = sshll.u32 %s670_s9, 4  ;;  %s609_s10 = int_to_ptr.vmem [resolvable:$false] %s608_s10 }
  0x14   : > { %p606_p0 = pnand %p604_p13, %p592_p12  ;;  %s610_s11 = scalar_lea.vmem %s609_s10, 256 }
  0x15   : > { %p611_p2 = scmp.lt.s32.totalorder %s167_s5, %s609_s10  ;;  %p612_p3 = scmp.lt.s32.totalorder %s610_s11, %s603_s8 }
  0x16   : > { %p607_p1 = pneg %p606_p0 }
  0x17   : > { %p613_p4 = por %p612_p3, %p611_p2 }
  0x19   : > { %p614_p5 = pnand %p613_p4, %p607_p1 }
  0x1b   : > { %617 = shalt.err (!%p614_p5)
}
  0x1c   : > { %525 = dma.hbm_to_vmem [thread:$0]  (!%p752_p9), %s164_s30, 128, %s167_s5, %s153_s7  }
  0x1d   : > { %p184_p6 = pnand %p514_p10, %p183_p11 }
  0x1e   : > { %s189_s12 = sand.u32 (!%p184_p6), 1, %s652_s13  }
  0x1f   : > { %187 = sbr.rel (%p184_p6) target bundleno = 341 (0x155), region = 32  ;;  %s515_s18 = sshll.u32 (!%p184_p6), %s189_s12, 3 }
  0x20   : > { %s190_s20 = scalar_lea.sflag (!%p184_p6), [#allocation4], %s189_s12  ;;  %s193_s21 = scalar_lea.vmem (!%p184_p6), [#allocation3], %s515_s18 }
  0x24   : > { %643 = dma.done.wait (%p737_p7), %s190_s20, 128  }
  0x25   : > { %645 = vsyncadd (%p737_p7), %s190_s20, 4294967168  ;;  %v239_v0 = vlaneseq  ;;  %v671_v1 = vmov 0   ;;  %v672_v3 = vmov 0.0   ;;  %vm248_vm1 = vcmask 1043456   ;;  %v329_v4 = vld [vmem:[%s845_s2] sm:$0xf] }
  0x26   : > { %578 = vset.pattern.permute.xlu0 %v671_v1  ;;  %v244_v5 = vld [vmem:[%s193_s21] sm:$0xff]  ;;  %p224_p7 = scmp.lt.s32.totalorder %s660_s15, 1  ;;  %vm414_vm4 = vcmask 1040384   ;;  %vm420_vm5 = vcmask 0  }
  0x27   : > { %vm771_vm0 = vcmp.lt.s32.totalorder %v239_v0, 256  ;;  %332 = vperm.xlu0 %578, %v329_v4   ;;  %v246_v6 = vcombine.high %v244_v5, %v244_v5  ;;  %v249_v7 = vsel %vm248_vm1, %v244_v5, -inf  ;;  %v789_v28 = vshrl.u32 %v239_v0, 7 }
  0x28   : > { %243 = vst.msk [vmem:[#allocation2] sm:$0x3] %vm771_vm0, %v672_v3  ;;  %v250_v8 = vrot.slane %v249_v7, 4  ;;  %s860_s15 = smov (!%p224_p7, %s660_s15), 1 }
  0x29   : > { %v256_v9 = vsel %vm248_vm1, %v246_v6, -inf  ;;  %s516_s23 = sshll.u32 %s860_s15, 1  ;;  %v296_v31 = vsub.s32 0, %v789_v28  ;;  %v300_v32 = vsub.s32 1, %v789_v28  ;;  %s234_s4 = scalar_lea.vmem %s846_s3, %s860_s15 }
  0x2a   : > { %v251_v10 = vmax.f32 %v249_v7, %v250_v8  ;;  %v257_v11 = vrot.slane %v256_v9, 4  ;;  %s230_s28 = scalar_lea.vmem %s844_s1, %s516_s23 }
  0x2b   : > { %v291_v34 = vld [vmem:[%s230_s28] sm:$0x3] }
  0x2c   : > { %v252_v12 = vrot.slane %v251_v10, 2  ;;  %v258_v13 = vmax.f32 %v256_v9, %v257_v11  ;;  %v297_v36 = vrot.slane %v291_v34, %v296_v31  ;;  %v301_v38 = vrot.slane %v291_v34, %v300_v32 }
  0x2e   : > { %v259_v14 = vrot.slane %v258_v13, 2  ;;  %v253_v15 = vmax.f32 %v251_v10, %v252_v12  ;;  %vm302_vm2 = vcmp.eq.s32.totalorder %v789_v28, %v297_v36  ;;  %vm303_vm3 = vcmp.eq.s32.totalorder %v789_v28, %v301_v38 }
  0x30   : > { %v260_v16 = vmax.f32 %v258_v13, %v259_v14  ;;  %v254_v17 = vrot.slane %v253_v15, 1 }
  0x32   : > { %v261_v18 = vrot.slane %v260_v16, 1  ;;  %v255_v19 = vmax.f32 %v253_v15, %v254_v17 }
  0x34   : > { %v262_v20 = vmax.f32 %v260_v16, %v261_v18 }
  0x36   : > { %v265_v21 = vcombine.low %v255_v19, %v262_v20 }
  0x38   : > { %v267_v22 = vsub.f32 %v244_v5, %v265_v21 }
  0x3a   : > { %v268_v23 = vmul.f32 1.442695, %v267_v22  ;;  %v305_v40 = vcombine.high %v267_v22, %v267_v22  ;;  %v307_v43 = vsel %vm302_vm2, %v267_v22, 0.0 }
  0x3b   : > { %v309_v47 = vsel %vm248_vm1, %v307_v43, 0.0 }
  0x3c   : > { %580 = vpow2.f32 %v268_v23  ;;  %v308_v44 = vsel %vm303_vm3, %v305_v40, 0.0  ;;  %v310_v50 = vrot.slane %v309_v47, 4 }
  0x3d   : > { %v316_v48 = vsel %vm248_vm1, %v308_v44, 0.0 }
  0x3e   : > { %v317_v52 = vrot.slane %v316_v48, 4  ;;  %v311_v53 = vadd.f32 %v310_v50, %v309_v47 }
  0x40   : > { %v318_v54 = vadd.f32 %v317_v52, %v316_v48  ;;  %v312_v55 = vrot.slane %v311_v53, 2  ;;  %v370_v48 = vld [vmem:[#allocation2] sm:$0x3] }
  0x42   : > { %v319_v56 = vrot.slane %v318_v54, 2  ;;  %v313_v57 = vadd.f32 %v312_v55, %v311_v53 }
  0x44   : > { %v320_v58 = vadd.f32 %v319_v56, %v318_v54  ;;  %v314_v59 = vrot.slane %v313_v57, 1 }
  0x46   : > { %v321_v61 = vrot.slane %v320_v58, 1  ;;  %v315_v0 = vadd.f32 %v314_v59, %v313_v57 }
  0x48   : > { %v322_v3 = vadd.f32 %v321_v61, %v320_v58 }
  0x49   : > { %v581_v24 = vpop.eup %580 }
  0x4a   : > { %v271_v25 = vcombine.high %v581_v24, %v581_v24  ;;  %v273_v26 = vsel %vm248_vm1, %v581_v24, 0.0 }
  0x4b   : > { %v274_v29 = vrot.slane %v273_v26, 4 }
  0x4c   : > { %v280_v27 = vsel %vm248_vm1, %v271_v25, 0.0  ;;  %v673_v25 = vmov 1966171168  }
  0x4d   : > { %v281_v30 = vrot.slane %v280_v27, 4  ;;  %v275_v33 = vadd.f32 %v274_v29, %v273_v26  ;;  %v379_v26 = vunpack.c.l.s4 %v673_v25 }
  0x4f   : > { %v282_v35 = vadd.f32 %v281_v30, %v280_v27  ;;  %v276_v37 = vrot.slane %v275_v33, 2  ;;  %v380_v36 = vunpack.c.0.s8 %v379_v26 }
  0x51   : > { %v283_v39 = vrot.slane %v282_v35, 2  ;;  %v277_v41 = vadd.f32 %v276_v37, %v275_v33  ;;  %v383_v43 = vsub.s32 %v380_v36, %v789_v28 }
  0x53   : > { %v284_v42 = vadd.f32 %v283_v39, %v282_v35  ;;  %v278_v45 = vrot.slane %v277_v41, 1 }
  0x55   : > { %v285_v46 = vrot.slane %v284_v42, 1  ;;  %v279_v49 = vadd.f32 %v278_v45, %v277_v41 }
  0x57   : > { %v286_v51 = vadd.f32 %v285_v46, %v284_v42  ;;  %582 = vlog2.f32 %v279_v49 }
  0x59   : > { %584 = vlog2.f32 %v286_v51 }
  0x64   : > { %v583_v60 = vpop.eup %582 }
  0x65   : > { %v288_v63 = vmul.f32 0.6931472, %v583_v60 }
  0x66   : > { %v585_v62 = vpop.eup %584 }
  0x67   : > { %v290_v1 = vmul.f32 0.6931472, %v585_v62  ;;  %v323_v4 = vsub.f32 %v315_v0, %v288_v63 }
  0x69   : > { %v324_v5 = vsub.f32 %v322_v3, %v290_v1  ;;  %v325_v6 = vmul.f32 1.442695, %v323_v4 }
  0x6b   : > { %v327_v7 = vmul.f32 1.442695, %v324_v5  ;;  %586 = vpow2.f32 %v325_v6 }
  0x6d   : > { %588 = vpow2.f32 %v327_v7 }
  0x78   : > { %v587_v8 = vpop.eup %586 }
  0x79   : > { %v353_v13 = vsub.f32 1.0, %v587_v8 }
  0x7a   : > { %v589_v9 = vpop.eup %588 }
  0x7b   : > { %v354_v14 = vsub.f32 1.0, %v589_v9  ;;  %v355_v21 = vmax.f32 %v353_v13, 0.0 }
  0x7d   : > { %v356_v22 = vmax.f32 %v354_v14, 0.0  ;;  %v357_v30 = vmul.f32 %v355_v21, %v355_v21 }
  0x7f   : > { %v358_v33 = vmul.f32 %v356_v22, %v356_v22  ;;  %v359_v39 = vmul.f32 -1.0, %v357_v30 }
  0x81   : > { %v360_v40 = vmul.f32 -1.0, %v358_v33 }
  0xa2   : > { %v333_v10 = vpop.permute.xlu0 %332 }
  0xa3   : > { %v335_v11 = vsel %vm302_vm2, %v333_v10, 0.0  ;;  %v336_v12 = vsel %vm303_vm3, %v333_v10, 0.0 }
  0xa4   : > { %v337_v15 = vsel %vm248_vm1, %v335_v11, 0.0  ;;  %v344_v16 = vsel %vm248_vm1, %v336_v12, 0.0 }
  0xa5   : > { %v338_v17 = vrot.slane %v337_v15, 4  ;;  %v345_v18 = vrot.slane %v344_v16, 4 }
  0xa7   : > { %v339_v19 = vadd.f32 %v338_v17, %v337_v15  ;;  %v346_v20 = vadd.f32 %v345_v18, %v344_v16 }
  0xa9   : > { %v340_v23 = vrot.slane %v339_v19, 2  ;;  %v347_v24 = vrot.slane %v346_v20, 2 }
  0xab   : > { %v341_v27 = vadd.f32 %v340_v23, %v339_v19  ;;  %v348_v29 = vadd.f32 %v347_v24, %v346_v20 }
  0xad   : > { %v342_v34 = vrot.slane %v341_v27, 1  ;;  %v349_v35 = vrot.slane %v348_v29, 1 }
  0xaf   : > { %v343_v37 = vadd.f32 %v342_v34, %v341_v27  ;;  %v350_v38 = vadd.f32 %v349_v35, %v348_v29 }
  0xb1   : > { %v351_v41 = vmul.f32 %v343_v37, %v323_v4  ;;  %v352_v42 = vmul.f32 %v350_v38, %v324_v5 }
  0xb3   : > { %v361_v44 = vmul.f32 %v359_v39, %v351_v41  ;;  %v362_v45 = vmul.f32 %v360_v40, %v352_v42 }
  0xb5   : > { %v377_v46 = vcombine.low %v361_v44, %v362_v45 }
  0xb7   : > { %v384_v47 = vrot.slane %v377_v46, %v383_v43 }
  0xb9   : > { %v391_v49 = vrot.slane %v384_v47, %v383_v43 }
  0xbb   : > { %v393_v50 = vadd.f32 %v391_v49, %v370_v48 }
  0xbd   : > { %398 = vst.msk [vmem:[#allocation2] sm:$0x3] %vm771_vm0, %v393_v50 }
  0xc4   : > { %v402_v51 = vld [vmem:[#allocation2] sm:$0x3] }
  0xc5   : > { %v407_v52 = vrot.slane %v402_v51, %v296_v31  ;;  %v411_v53 = vrot.slane %v402_v51, %v300_v32 }
  0xc7   : > { %v415_v54 = vsel %vm414_vm4, %v407_v52, 0.0  ;;  %v416_v55 = vsel %vm414_vm4, %v411_v53, 0.0 }
  0xc8   : > { %v417_v56 = vadd.f32 %v416_v55, %v415_v54 }
  0xca   : > { %418 = vadd.xlane.f32.xlu0 %v417_v56 }
 0x153   : > { %v419_v57 = vpop.xlane.xlu0 %418 }
 0x154   : > { %421 = vst.msk [vmem:[%s234_s4] sm:$0x1] %vm420_vm5, %v419_v57 }
 0x155 PF: > { %s16_s17 = sadd.s32 1, %s668_s17   ;;  %s852_s12 = smov %s652_s13 }
 0x156   : > { %p13_p8 = scmp.ge.s32.totalorder %s16_s17, 4   ;;  %s853_s13 = smov %s656_s14 }
 0x157   : > { %s854_s14 = smov %s743_s24  ;;  %s855_s15 = smov %s664_s16 }
 0x158   : > { %s856_s16 = smov %s858_s19  ;;  %15 = sbr.rel (!%p13_p8) target bundleno = 4 (0x4), region = 83 }
 0x15d   :  { %439 = vsyncpa [#allocation4], 1 }
 0x15e   :  { %441 = vsyncpa [#allocation4 + $0x1], 1 }

</bundles_post_ra>
